<compile_context>
chip_gen: v6e
topology: v6e:2x2x1
jax: 0.10.0
libtpu: 0.0.40
codegen_flags: <defaults>
</compile_context>

<pallas_src>
import jax
import jax.numpy as jnp
from jax.experimental import pallas as pl
from jax.experimental.pallas import tpu as pltpu


_MASK_RESIDENT_BYTES = 2 * 1024 * 1024  # keep mask fully VMEM-resident below this


def _round_up(x, m):
    return -(-x // m) * m


def _chip_config():
    """Per-generation tuning: (block_budget_f32_elems, vmem_limit_bytes, n_buffers)."""
    vmem_cap = 128 * 1024 * 1024
    try:
        vmem_cap = int(pltpu.get_tpu_info().vmem_capacity_bytes)
    except Exception:
        pass
    if vmem_cap >= 96 * 1024 * 1024:
        # v5e / v6e: single TensorCore, 128 MiB VMEM -> bigger (~4 MiB) blocks to
        # amortize the ~0.35us/step overhead; standard double buffering.
        return 1024 * 1024, 64 * 1024 * 1024, 2
    # v7x: 64 MiB VMEM, 3.2 TB/s HBM -> keep ~2 MiB blocks, buffer deeper instead.
    return 512 * 1024, 48 * 1024 * 1024, 3


def _pick_tiles(c_kept, hw, budget):
    """tile_c (multiple of 8, divides c_kept) and tile_hw (multiple of 128,
    divides hw), with tile_c*tile_hw <= budget.  Returns None when only a
    degenerate (tiny tile_hw) tiling exists; the caller then pads hw instead."""
    cap_hw = max(128, (budget // 8) // 128 * 128)
    if hw <= cap_hw:
        tile_hw = hw
    else:
        tile_hw = cap_hw
        while hw % tile_hw != 0:
            tile_hw -= 128
        if tile_hw < 2048:
            return None  # would mean thousands of tiny grid steps -> pad instead
    max_c = max(8, (budget // tile_hw) // 8 * 8)
    tile_c = min(max_c, c_kept)
    tile_c = (tile_c // 8) * 8
    while c_kept % tile_c != 0:
        tile_c -= 8
    return tile_c, tile_hw


def _make_tiled_kernel(use_mse, tile_c, tile_hw, mask_resident):
    def kernel(former_ref, mask_ref, target_ref, out_ref, acc_ref):
        hb = pl.program_id(2)

        @pl.when(hb == 0)
        def _():
            acc_ref[...] = jnp.zeros_like(acc_ref)

        f = former_ref[0].astype(jnp.float32)          # (tile_c, tile_hw)
        t = target_ref[0].astype(jnp.float32)
        if mask_resident:
            start = pl.multiple_of(hb * tile_hw, tile_hw)
            m = mask_ref[:, pl.ds(start, tile_hw)]     # resident mask, sliced in VMEM
        else:
            m = mask_ref[...]                          # (1, tile_hw)
        d = f * m - t
        dd = (d * d) if use_mse else jnp.abs(d)
        # Single-vreg (8,128) partial sum: the reshape exposes the vreg grid
        # (sublane groups of 8, lane groups of 128) and the two reductions are
        # cross-vreg VPU adds; no block-sized scratch load/store per step.
        acc_ref[...] += dd.reshape(tile_c // 8, 8, tile_hw // 128, 128
                                   ).sum(axis=2).sum(axis=0)

        @pl.when(hb == pl.num_programs(2) - 1)
        def _():
            out_ref[...] = jnp.full(out_ref.shape, jnp.sum(acc_ref[...]),
                                    jnp.float32)

    return kernel


def _tiled_loss_sum(former3, mask2, target3, c_keep, tile_c, tile_hw,
                    use_mse, vmem_limit, n_buffers):
    n = former3.shape[0]
    hw = former3.shape[-1]
    c_blocks = c_keep // tile_c
    hw_blocks = hw // tile_hw
    mask_resident = hw * 4 <= _MASK_RESIDENT_BYTES

    data_block = (1, tile_c, tile_hw)
    data_map = lambda nn, cb, hb: (nn, cb, hb)   # channel narrow lives here

    def data_spec():
        if n_buffers > 2:
            try:  # deeper pipelining on v7x; fall back silently if unavailable
                return pl.BlockSpec(data_block, data_map,
                                    pipeline_mode=pl.Buffered(n_buffers))
            except Exception:
                pass
        return pl.BlockSpec(data_block, data_map)

    if mask_resident:
        mask_spec = pl.BlockSpec((1, hw), lambda nn, cb, hb: (0, 0))
    else:
        mask_spec = pl.BlockSpec((1, tile_hw), lambda nn, cb, hb: (0, hb))

    partials = pl.pallas_call(
        _make_tiled_kernel(use_mse, tile_c, tile_hw, mask_resident),
        out_shape=jax.ShapeDtypeStruct((n, c_blocks, 1, 128), jnp.float32),
        grid_spec=pltpu.PrefetchScalarGridSpec(
            num_scalar_prefetch=0,
            grid=(n, c_blocks, hw_blocks),
            in_specs=[data_spec(), mask_spec, data_spec()],
            out_specs=pl.BlockSpec((1, 1, 1, 128),
                                   lambda nn, cb, hb: (nn, cb, 0, 0)),
            scratch_shapes=[pltpu.VMEM((8, 128), jnp.float32)],
        ),
        compiler_params=pltpu.CompilerParams(
            dimension_semantics=("parallel", "parallel", "arbitrary"),
            vmem_limit_bytes=vmem_limit,
        ),
    )(former3, mask2, target3)
    return jnp.sum(partials[:, :, 0, 0])


def _make_full_kernel(use_mse):
    def kernel(former_ref, mask_ref, target_ref, out_ref):
        f = former_ref[0].astype(jnp.float32)   # (c_keep, hw), full dims per batch
        t = target_ref[0].astype(jnp.float32)
        m = mask_ref[...]                        # (1, hw)
        d = f * m - t
        dd = (d * d) if use_mse else jnp.abs(d)
        out_ref[...] = jnp.full(out_ref.shape, jnp.sum(dd), jnp.float32)

    return kernel


def _full_loss_sum(former3, mask2, target3, c_keep, use_mse, vmem_limit):
    n = former3.shape[0]
    hw = former3.shape[-1]
    partials = pl.pallas_call(
        _make_full_kernel(use_mse),
        out_shape=jax.ShapeDtypeStruct((n, 1, 128), jnp.float32),
        grid_spec=pltpu.PrefetchScalarGridSpec(
            num_scalar_prefetch=0,
            grid=(n,),
            in_specs=[pl.BlockSpec((1, c_keep, hw), lambda nn: (nn, 0, 0)),
                      pl.BlockSpec((1, hw), lambda nn: (0, 0)),
                      pl.BlockSpec((1, c_keep, hw), lambda nn: (nn, 0, 0))],
            out_specs=pl.BlockSpec((1, 1, 128), lambda nn: (nn, 0, 0)),
        ),
        compiler_params=pltpu.CompilerParams(
            dimension_semantics=("parallel",),
            vmem_limit_bytes=vmem_limit,
        ),
    )(former3, mask2, target3)
    return jnp.sum(partials[:, 0, 0])


def inner_cos2_forward(in_data, mask, target, *, strength=1.0, skip=0, crit="MSE"):
    """Returns (output, loss) matching InnerCos2.forward."""
    if skip:
        return in_data, jnp.zeros((), jnp.float32)

    n, c, h, w = in_data.shape
    tn, c_keep, th, tw = target.shape
    assert tn == n and th == h and tw == w, "target must match in_data on N/H/W"
    assert c >= c_keep, "in_data needs at least as many channels as target"
    hw = h * w
    use_mse = crit == "MSE"

    budget, vmem_limit, n_buffers = _chip_config()

    # Fold strength into the (tiny) mask once, in f32.
    mask2 = mask.reshape(1, hw).astype(jnp.float32) * strength
    denom = jnp.float32(n * c_keep * h * w)   # true element count (excludes any padding)

    if c_keep % 8 == 0 and hw % 128 == 0:
        # Fast path: zero-copy reshapes; channel narrow expressed in the index_map.
        tiles = _pick_tiles(c_keep, hw, budget)
        if tiles is not None:
            former3 = in_data.reshape(n, c, hw)
            target3 = target.reshape(n, c_keep, hw)
            loss_sum = _tiled_loss_sum(former3, mask2, target3, c_keep,
                                       tiles[0], tiles[1], use_mse,
                                       vmem_limit, n_buffers)
            return in_data, loss_sum / denom
    elif c_keep * hw <= budget:
        # Unaligned-but-small: full-dim blocks ((8,128) rule is waived when the
        # block equals the full array dims) -> no wrapper-side padding pass.
        if c_keep == c or c_keep % 8 == 0:
            former3 = in_data.reshape(n, c, hw)   # narrow via block index_map
        else:
            # Rare corner: a non-multiple-of-8 channel narrow must be materialized.
            former3 = in_data[:, :c_keep].reshape(n, c_keep, hw)
        target3 = target.reshape(n, c_keep, hw)
        loss_sum = _full_loss_sum(former3, mask2, target3, c_keep, use_mse,
                                  vmem_limit)
        return in_data, loss_sum / denom

    # Last resort (unaligned-and-large, or pathological hw divisors): zero-pad.
    # Padded elements contribute exactly 0 to both MSE and L1 numerators.
    c_kept = _round_up(c_keep, 8)
    cap_hw = max(128, (budget // 8) // 128 * 128)
    hw_p = _round_up(hw, 128)
    if hw_p > cap_hw:
        hw_p = _round_up(hw_p, cap_hw)
    former3 = jnp.pad(in_data[:, :c_keep].reshape(n, c_keep, hw),
                      ((0, 0), (0, c_kept - c_keep), (0, hw_p - hw)))
    target3 = jnp.pad(target.reshape(n, c_keep, hw),
                      ((0, 0), (0, c_kept - c_keep), (0, hw_p - hw)))
    mask2p = jnp.pad(mask2, ((0, 0), (0, hw_p - hw)))
    tile_c, tile_hw = _pick_tiles(c_kept, hw_p, budget)
    loss_sum = _tiled_loss_sum(former3, mask2p, target3, c_kept, tile_c, tile_hw,
                               use_mse, vmem_limit, n_buffers)
    return in_data, loss_sum / denom


def _reference_loss(in_data, mask, target, strength=1.0, crit="MSE"):
    c_keep = target.shape[1]
    former = in_data[:, :c_keep].astype(jnp.float32)
    d = former * mask[None, None].astype(jnp.float32) * strength - target.astype(jnp.float32)
    return jnp.mean(d * d) if crit == "MSE" else jnp.mean(jnp.abs(d))


if __name__ == "__main__":
    key = jax.random.PRNGKey(0)
    k1, k2, k3, k4, k5, k6 = jax.random.split(key, 6)

    fwd = jax.jit(inner_cos2_forward, static_argnames=("strength", "skip", "crit"))

    # --- Test 1: aligned fast path (zero-copy narrow via index_map), MSE ---
    N, C, C_KEEP, H, W = 2, 16, 8, 16, 16
    x = jax.random.normal(k1, (N, C, H, W), dtype=jnp.float32)
    tgt = jax.random.normal(k2, (N, C_KEEP, H, W), dtype=jnp.float32)
    msk = (jax.random.uniform(k3, (H, W)) > 0.5).astype(jnp.float32)

    out, loss = fwd(x, msk, tgt, strength=2.0, skip=0, crit="MSE")
    out = jax.block_until_ready(out)
    loss = jax.block_until_ready(loss)
    ref = _reference_loss(x, msk, tgt, strength=2.0, crit="MSE")
    assert jnp.allclose(loss, ref, rtol=1e-5, atol=1e-6), (loss, ref)
    assert jnp.array_equal(out, x)

    # --- Test 2: unaligned shapes take the no-padding full-block path, MSE ---
    N2, C2, CK2, H2, W2 = 2, 8, 4, 10, 10
    x2 = jax.random.normal(k4, (N2, C2, H2, W2), dtype=jnp.float32)
    t2 = jax.random.normal(k5, (N2, CK2, H2, W2), dtype=jnp.float32)
    m2 = (jax.random.uniform(k6, (H2, W2)) > 0.5).astype(jnp.float32)
    out2, loss2 = fwd(x2, m2, t2, strength=1.0, skip=0, crit="MSE")
    jax.block_until_ready(loss2)
    ref2 = _reference_loss(x2, m2, t2, strength=1.0, crit="MSE")
    assert jnp.allclose(loss2, ref2, rtol=1e-5, atol=1e-6), (loss2, ref2)
    assert jnp.array_equal(out2, x2)

    # --- Test 3: L1 criterion on the fast path ---
    _, loss3 = fwd(x, msk, tgt, strength=1.0, skip=0, crit="L1")
    jax.block_until_ready(loss3)
    ref3 = _reference_loss(x, msk, tgt, strength=1.0, crit="L1")
    assert jnp.allclose(loss3, ref3, rtol=1e-5, atol=1e-6), (loss3, ref3)

    # --- Test 4: skip path is a pure identity with zero loss ---
    out4, loss4 = fwd(x, msk, tgt, strength=1.0, skip=1, crit="MSE")
    assert jnp.array_equal(jax.block_until_ready(out4), x) and float(loss4) == 0.0

    # --- Test 5: bf16 activations stay bf16 in HBM; kernel upcasts in VMEM ---
    xb = x.astype(jnp.bfloat16)
    tb = tgt.astype(jnp.bfloat16)
    out5, loss5 = fwd(xb, msk, tb, strength=1.0, skip=0, crit="MSE")
    jax.block_until_ready(loss5)
    ref5 = _reference_loss(xb, msk, tb, strength=1.0, crit="MSE")
    assert jnp.allclose(loss5, ref5, rtol=2e-2, atol=1e-3), (loss5, ref5)
    assert jnp.array_equal(jax.block_until_ready(out5), xb)

    print("KERNEL_OK")
</pallas_src>

<mosaic_0001>
module attributes {stable_mosaic.version = 11 : i64} {
  func.func @kernel(%arg0: i32, %arg1: i32, %arg2: i32, %arg3: memref<1x8x256xf32, #tpu.memory_space<vmem>>, %arg4: memref<1x256xf32, #tpu.memory_space<vmem>>, %arg5: memref<1x8x256xf32, #tpu.memory_space<vmem>>, %arg6: memref<1x1x1x128xf32, #tpu.memory_space<vmem>>, %arg7: memref<8x128xf32, #tpu.memory_space<vmem>>) attributes {dimension_semantics = [#tpu.dimension_semantics<parallel>, #tpu.dimension_semantics<parallel>, #tpu.dimension_semantics<arbitrary>], iteration_bounds = array<i64: 2, 1, 1>, scalar_prefetch = 0 : i64, scratch_operands = 1 : i64, tpu.core_type = #tpu.core_type<tc>, window_params = [{transform_indices = @transform_0, window_bounds = array<i64: 1, 8, 256>}, {pipeline_mode = #tpu.pipeline_mode<synchronous>, transform_indices = @transform_1, window_bounds = array<i64: 1, 256>}, {transform_indices = @transform_2, window_bounds = array<i64: 1, 8, 256>}, {transform_indices = @transform_3, window_bounds = array<i64: 1, 1, 1, 128>}]} {
    %c0_i32 = arith.constant 0 : i32
    %0 = arith.cmpi eq, %arg2, %c0_i32 : i32
    %1 = arith.extui %0 : i1 to i32
    %c0_i32_0 = arith.constant 0 : i32
    %2 = arith.cmpi ne, %1, %c0_i32_0 : i32
    scf.if %2 {
      %cst_14 = arith.constant 0.000000e+00 : f32
      %24 = vector.broadcast %cst_14 : f32 to vector<8x128xf32>
      %c0_15 = arith.constant 0 : index
      %c0_16 = arith.constant 0 : index
      %25 = vector.load %arg7[%c0_15, %c0_16] : memref<8x128xf32, #tpu.memory_space<vmem>>, vector<8x128xf32>
      tpu.vector_store %arg7[%c0_15, %c0_16], %24 {strides = array<i32>} : memref<8x128xf32, #tpu.memory_space<vmem>>, vector<8x128xf32>,
    } else {
    }
    %c0 = arith.constant 0 : index
    %c0_1 = arith.constant 0 : index
    %c0_2 = arith.constant 0 : index
    %3 = vector.load %arg3[%c0, %c0_1, %c0_2] : memref<1x8x256xf32, #tpu.memory_space<vmem>>, vector<1x8x256xf32>
    %4 = vector.shape_cast %3 : vector<1x8x256xf32> to vector<8x256xf32>
    %c0_3 = arith.constant 0 : index
    %c0_4 = arith.constant 0 : index
    %c0_5 = arith.constant 0 : index
    %5 = vector.load %arg5[%c0_3, %c0_4, %c0_5] : memref<1x8x256xf32, #tpu.memory_space<vmem>>, vector<1x8x256xf32>
    %6 = vector.shape_cast %5 : vector<1x8x256xf32> to vector<8x256xf32>
    %c256_i32 = arith.constant 256 : i32
    %7 = arith.muli %arg2, %c256_i32 : i32
    %8 = tpu.assume_multiple %7, 256 : i32
    %c0_6 = arith.constant 0 : index
    %9 = arith.index_cast %8 : i32 to index
    %10 = vector.load %arg4[%c0_6, %9] : memref<1x256xf32, #tpu.memory_space<vmem>>, vector<1x256xf32>
    %11 = vector.broadcast %10 : vector<1x256xf32> to vector<8x256xf32>
    %12 = arith.mulf %4, %11 : vector<8x256xf32>
    %13 = arith.subf %12, %6 : vector<8x256xf32>
    %14 = arith.mulf %13, %13 : vector<8x256xf32>
    %c0_7 = arith.constant 0 : index
    %c0_8 = arith.constant 0 : index
    %15 = vector.load %arg7[%c0_7, %c0_8] : memref<8x128xf32, #tpu.memory_space<vmem>>, vector<8x128xf32>
    %16 = vector.shape_cast %14 : vector<8x256xf32> to vector<1x8x2x128xf32>
    %cst = arith.constant dense<0.000000e+00> : vector<1x8x128xf32>
    %17 = vector.multi_reduction <add>, %16, %cst [2] : vector<1x8x2x128xf32> to vector<1x8x128xf32>
    %cst_9 = arith.constant dense<0.000000e+00> : vector<8x128xf32>
    %18 = vector.multi_reduction <add>, %17, %cst_9 [0] : vector<1x8x128xf32> to vector<8x128xf32>
    %19 = arith.addf %15, %18 : vector<8x128xf32>
    %c0_10 = arith.constant 0 : index
    %c0_11 = arith.constant 0 : index
    %20 = vector.load %arg7[%c0_10, %c0_11] : memref<8x128xf32, #tpu.memory_space<vmem>>, vector<8x128xf32>
    tpu.vector_store %arg7[%c0_10, %c0_11], %19 {strides = array<i32>} : memref<8x128xf32, #tpu.memory_space<vmem>>, vector<8x128xf32>,
    %c0_i32_12 = arith.constant 0 : i32
    %21 = arith.cmpi eq, %arg2, %c0_i32_12 : i32
    %22 = arith.extui %21 : i1 to i32
    %c0_i32_13 = arith.constant 0 : i32
    %23 = arith.cmpi ne, %22, %c0_i32_13 : i32
    scf.if %23 {
      %c0_14 = arith.constant 0 : index
      %c0_15 = arith.constant 0 : index
      %24 = vector.load %arg7[%c0_14, %c0_15] : memref<8x128xf32, #tpu.memory_space<vmem>>, vector<8x128xf32>
      %25 = vector.shape_cast %24 : vector<8x128xf32> to vector<1x8x128xf32>
      %cst_16 = arith.constant dense<0.000000e+00> : vector<1xf32>
      %26 = vector.multi_reduction <add>, %25, %cst_16 [1, 2] : vector<1x8x128xf32> to vector<1xf32>
      %27 = vector.shape_cast %26 : vector<1xf32> to vector<1x1x1xf32>
      %28 = vector.extract %27[0, 0, 0] : f32 from vector<1x1x1xf32>
      %29 = vector.broadcast %28 : f32 to vector<1x1x1x128xf32>
      %c0_17 = arith.constant 0 : index
      %c0_18 = arith.constant 0 : index
      %c0_19 = arith.constant 0 : index
      %c0_20 = arith.constant 0 : index
      %30 = vector.load %arg6[%c0_17, %c0_18, %c0_19, %c0_20] : memref<1x1x1x128xf32, #tpu.memory_space<vmem>>, vector<1x1x1x128xf32>
      tpu.vector_store %arg6[%c0_17, %c0_18, %c0_19, %c0_20], %29 {strides = array<i32>} : memref<1x1x1x128xf32, #tpu.memory_space<vmem>>, vector<1x1x1x128xf32>,
    } else {
    }
    return
  }
  func.func @transform_0(%arg0: i32, %arg1: i32, %arg2: i32) -> (i32, i32, i32) {
    %c0_i32 = arith.constant 0 : i32
    return %arg0, %arg1, %arg2 : i32, i32, i32
  }
  func.func @transform_1(%arg0: i32, %arg1: i32, %arg2: i32) -> (i32, i32) {
    %c0_i32 = arith.constant 0 : i32
    %c0_i32_0 = arith.constant 0 : i32
    %c0_i32_1 = arith.constant 0 : i32
    return %c0_i32, %c0_i32_0 : i32, i32
  }
  func.func @transform_2(%arg0: i32, %arg1: i32, %arg2: i32) -> (i32, i32, i32) {
    %c0_i32 = arith.constant 0 : i32
    return %arg0, %arg1, %arg2 : i32, i32, i32
  }
  func.func @transform_3(%arg0: i32, %arg1: i32, %arg2: i32) -> (i32, i32, i32, i32) {
    %c0_i32 = arith.constant 0 : i32
    %c0_i32_0 = arith.constant 0 : i32
    %c0_i32_1 = arith.constant 0 : i32
    return %arg0, %arg1, %c0_i32, %c0_i32_0 : i32, i32, i32, i32
  }
}

</mosaic_0001>

<bundles_post_ra>
// kernel: inner_cos2_forward.1
= control target key start
LH: loop header
LB: loop body
LE: loop exit
PB: predicated region body
PF: predicated region fallthrough
CT: control target
= control target key end

     0   :  { %s671_s12 = smov 0   ;;  %s673_s13 = smov 0   ;;  %s725_s0 = inlined_call_operand.vmem [shape: f32[2,16,256], index: 0, kind: input, shape index: {}]   ;;  %s726_s1 = inlined_call_operand.vmem [shape: f32[1,256], index: 1, kind: input, shape index: {}]   ;;  %s727_s2 = inlined_call_operand.vmem [shape: f32[2,8,256], index: 2, kind: input, shape index: {}]   ;;  %s728_s3 = inlined_call_operand.vmem [shape: f32[2,1,1,128], index: 3, kind: output, shape index: {}]  }
   0x1   :  { %s675_s14 = smov 0  }
   0x2 LB: > { %s32_s15 = sadd.s32 1, %s642_s13  ;;  %p586_p0 = scmp.ge.s32.totalorder %s646_s14, 1  ;;  %s646_s14 = sphi %s675_s14, %s13_s14   ;;  %s642_s13 = sphi %s673_s13, %s730_s13   ;;  %s638_s12 = sphi %s671_s12, %s729_s12  }
   0x3   : > { %p34_p1 = scmp.ge.s32.totalorder %s32_s15, 2  ;;  %p194_p2 = scmp.lt.s32.totalorder %s646_s14, 3 }
   0x5   : > { %s732_s15 = smov (%p34_p1, %s32_s15), 0  ;;  %p195_p3 = pnand %p586_p0, %p194_p2 }
   0x6   : > { %p241_p4 = scmp.lt.s32.totalorder (!%p195_p3), %s638_s12, 1 }
   0x7   : > { %198 = sbr.rel (%p195_p3) target bundleno = 256 (0x100), region = 32 }
   0xc   : > { %v289_v0 = vlaneseq  ;;  %s734_s12 = smov (!%p241_p4, %s638_s12), 1  ;;  %v648_v2 = vmov 1983009808   ;;  %v287_v4 = vld [vmem:[%s726_s1] sm:$0x3]  ;;  %v650_v25 = vmov 0.0  }
   0xd   : > { %v308_v3 = vunpack.c.l.s4 %v648_v2  ;;  %s593_s18 = sshll.u32 %s734_s12, 5  ;;  %s594_s19 = sshll.u32 %s734_s12, 4  ;;  %v649_v7 = vmov 1934713408   ;;  %vm372_vm0 = vcmask 1041408   ;;  %vm445_vm1 = vcmask 1041409  }
   0xe   : > { %v290_v1 = vshrl.u32 %v289_v0, 7  ;;  %s252_s22 = scalar_lea.vmem %s725_s0, %s593_s18  ;;  %s266_s25 = scalar_lea.vmem %s727_s2, %s594_s19  ;;  %v339_v8 = vunpack.c.l.s4 %v649_v7  ;;  %vm447_vm2 = vcmask 1042434   ;;  %vm449_vm3 = vcmask 1043459  }
   0xf   : > { %v279_v9 = vld [vmem:[%s252_s22] sm:$0xff]  ;;  %v280_v10 = vld [vmem:[%s252_s22 + $0x8] sm:$0xff]  ;;  %v309_v13 = vunpack.c.0.s8 %v308_v3  ;;  %vm451_vm4 = vcmask 1044484   ;;  %vm453_vm5 = vcmask 1045509   ;;  %vm455_vm6 = vcmask 1046534   ;;  %s273_s28 = scalar_lea.vmem %s728_s3, %s734_s12 }
  0x10   : > { %v291_v5 = vsub.s32 0, %v290_v1  ;;  %v295_v6 = vsub.s32 1, %v290_v1  ;;  %v281_v14 = vld [vmem:[%s266_s25] sm:$0xff]  ;;  %v282_v15 = vld [vmem:[%s266_s25 + $0x8] sm:$0xff]  ;;  %v340_v18 = vunpack.c.0.s8 %v339_v8  ;;  %vm457_vm7 = vcmask 1047559  }
  0x11   : > { %v312_v21 = vsub.s32 %v309_v13, %v290_v1 }
  0x12   : > { %v292_v11 = vrot.slane %v287_v4, %v291_v5  ;;  %v296_v12 = vrot.slane %v287_v4, %v295_v6  ;;  %v343_v24 = vsub.s32 %v340_v18, %v290_v1 }
  0x14   : > { %v299_v16 = vmul.f32 %v292_v11, %v279_v9  ;;  %v300_v17 = vmul.f32 %v296_v12, %v280_v10 }
  0x16   : > { %v301_v19 = vsub.f32 %v299_v16, %v281_v14  ;;  %v302_v20 = vsub.f32 %v300_v17, %v282_v15 }
  0x18   : > { %v303_v22 = vmul.f32 %v301_v19, %v301_v19  ;;  %v304_v23 = vmul.f32 %v302_v20, %v302_v20 }
  0x1a   : > { %v306_v26 = vcombine.high %v303_v22, %v650_v25  ;;  %v313_v27 = vrot.slane %v303_v22, %v312_v21  ;;  %v321_v28 = vcombine.high %v304_v23, %v650_v25  ;;  %v328_v29 = vrot.slane %v304_v23, %v312_v21 }
  0x1c   : > { %v320_v30 = vrot.slane %v306_v26, %v312_v21  ;;  %v335_v31 = vrot.slane %v321_v28, %v312_v21  ;;  %v336_v32 = vcombine.low %v313_v27, %v328_v29  ;;  %v337_v33 = vcombine.high %v313_v27, %v328_v29 }
  0x1e   : > { %v344_v34 = vrot.slane %v336_v32, %v343_v24  ;;  %v351_v35 = vrot.slane %v337_v33, %v343_v24  ;;  %v352_v36 = vcombine.low %v320_v30, %v335_v31  ;;  %v353_v37 = vcombine.high %v320_v30, %v335_v31 }
  0x20   : > { %v360_v38 = vrot.slane %v352_v36, %v343_v24  ;;  %v367_v39 = vrot.slane %v353_v37, %v343_v24  ;;  %v368_v40 = vcombine.high %v344_v34, %v650_v25  ;;  %v369_v41 = vcombine.high %v351_v35, %v650_v25 }
  0x21   : > { %v373_v42 = vsel %vm372_vm0, %v344_v34, 0.0  ;;  %v387_v43 = vsel %vm372_vm0, %v351_v35, 0.0 }
  0x22   : > { %v370_v44 = vcombine.high %v360_v38, %v650_v25  ;;  %v371_v45 = vcombine.high %v367_v39, %v650_v25  ;;  %v374_v46 = vrot.slane %v373_v42, 4  ;;  %v380_v47 = vsel %vm372_vm0, %v368_v40, 0.0 }
  0x23   : > { %v381_v48 = vrot.slane %v380_v47, 4  ;;  %v388_v49 = vrot.slane %v387_v43, 4  ;;  %v394_v50 = vsel %vm372_vm0, %v369_v41, 0.0  ;;  %v401_v51 = vsel %vm372_vm0, %v360_v38, 0.0 }
  0x24   : > { %v375_v52 = vadd.f32 %v374_v46, %v373_v42  ;;  %v395_v53 = vrot.slane %v394_v50, 4  ;;  %v402_v54 = vrot.slane %v401_v51, 4  ;;  %v408_v55 = vsel %vm372_vm0, %v370_v44, 0.0 }
  0x25   : > { %v382_v56 = vadd.f32 %v381_v48, %v380_v47  ;;  %v389_v57 = vadd.f32 %v388_v49, %v387_v43  ;;  %v409_v58 = vrot.slane %v408_v55, 4  ;;  %v415_v59 = vsel %vm372_vm0, %v367_v39, 0.0 }
  0x26   : > { %v376_v60 = vrot.slane %v375_v52, 2  ;;  %v396_v61 = vadd.f32 %v395_v53, %v394_v50  ;;  %v403_v62 = vadd.f32 %v402_v54, %v401_v51  ;;  %v416_v63 = vrot.slane %v415_v59, 4 }
  0x27   : > { %v383_v0 = vrot.slane %v382_v56, 2  ;;  %v390_v1 = vrot.slane %v389_v57, 2  ;;  %v410_v2 = vadd.f32 %v409_v58, %v408_v55  ;;  %v422_v3 = vsel %vm372_vm0, %v371_v45, 0.0 }
  0x28   : > { %v377_v4 = vadd.f32 %v376_v60, %v375_v52  ;;  %v397_v5 = vrot.slane %v396_v61, 2  ;;  %v404_v6 = vrot.slane %v403_v62, 2  ;;  %v417_v7 = vadd.f32 %v416_v63, %v415_v59 }
  0x29   : > { %v384_v8 = vadd.f32 %v383_v0, %v382_v56  ;;  %v391_v9 = vadd.f32 %v390_v1, %v389_v57  ;;  %v411_v10 = vrot.slane %v410_v2, 2  ;;  %v423_v11 = vrot.slane %v422_v3, 4 }
  0x2a   : > { %v378_v12 = vrot.slane %v377_v4, 1  ;;  %v398_v13 = vadd.f32 %v397_v5, %v396_v61  ;;  %v405_v14 = vadd.f32 %v404_v6, %v403_v62  ;;  %v418_v15 = vrot.slane %v417_v7, 2 }
  0x2b   : > { %v385_v16 = vrot.slane %v384_v8, 1  ;;  %v392_v17 = vrot.slane %v391_v9, 1  ;;  %v412_v18 = vadd.f32 %v411_v10, %v410_v2  ;;  %v424_v19 = vadd.f32 %v423_v11, %v422_v3 }
  0x2c   : > { %v379_v20 = vadd.f32 %v378_v12, %v377_v4  ;;  %v399_v21 = vrot.slane %v398_v13, 1  ;;  %v406_v22 = vrot.slane %v405_v14, 1  ;;  %v419_v23 = vadd.f32 %v418_v15, %v417_v7 }
  0x2d   : > { %v386_v24 = vadd.f32 %v385_v16, %v384_v8  ;;  %v393_v25 = vadd.f32 %v392_v17, %v391_v9  ;;  %v413_v26 = vrot.slane %v412_v18, 1  ;;  %v425_v27 = vrot.slane %v424_v19, 2 }
  0x2e   : > { %v400_v28 = vadd.f32 %v399_v21, %v398_v13  ;;  %v407_v29 = vadd.f32 %v406_v22, %v405_v14  ;;  %v420_v30 = vrot.slane %v419_v23, 1 }
  0x2f   : > { %v414_v31 = vadd.f32 %v413_v26, %v412_v18  ;;  %v426_v32 = vadd.f32 %v425_v27, %v424_v19  ;;  %v446_v33 = vsel %vm445_vm1, %v386_v24, %v379_v20 }
  0x30   : > { %v421_v34 = vadd.f32 %v420_v30, %v419_v23  ;;  %v448_v35 = vsel %vm447_vm2, %v393_v25, %v446_v33 }
  0x31   : > { %v427_v36 = vrot.slane %v426_v32, 1  ;;  %v450_v37 = vsel %vm449_vm3, %v400_v28, %v448_v35 }
  0x32   : > { %v452_v38 = vsel %vm451_vm4, %v407_v29, %v450_v37 }
  0x33   : > { %v428_v39 = vadd.f32 %v427_v36, %v426_v32  ;;  %v454_v40 = vsel %vm453_vm5, %v414_v31, %v452_v38 }
  0x34   : > { %v456_v41 = vsel %vm455_vm6, %v421_v34, %v454_v40 }
  0x35   : > { %v458_v42 = vsel %vm457_vm7, %v428_v39, %v456_v41 }
  0x36   : > { %466 = vadd.xlane.f32.xlu0 %v458_v42 }
  0xbf   : > { %v467_v43 = vpop.xlane.xlu0 %466 }
  0xc0   : > { %v468_v44 = vrot.slane %v467_v43, 4 }
  0xc2   : > { %v469_v45 = vadd.f32 %v468_v44, %v467_v43 }
  0xc4   : > { %v470_v46 = vrot.slane %v469_v45, 2 }
  0xc6   : > { %v471_v47 = vadd.f32 %v470_v46, %v469_v45 }
  0xc8   : > { %v472_v48 = vrot.slane %v471_v47, 1 }
  0xca   : > { %v473_v49 = vadd.f32 %v472_v48, %v471_v47 }
  0xcc   : > { %595 = vpush %v473_v49 }
  0xfd   : > { %s596_s29 = spop %595 }
  0xfe   : > { %v475_v50 = vstv %s596_s29 }
  0xff   : > { %476 = vst [vmem:[%s273_s28] sm:$0x1] %v475_v50 }
 0x100 PF: > { %s13_s14 = sadd.s32 1, %s646_s14   ;;  %s729_s12 = smov %s642_s13 }
 0x101   : > { %p10_p5 = scmp.ge.s32.totalorder %s13_s14, 4   ;;  %s730_s13 = smov %s732_s15 }
 0x103   :  { %12 = sbr.rel (!%p10_p5) target bundleno = 2 (0x2), region = 74 }

</bundles_post_ra>
